<compile_context>
chip_gen: v6e
topology: v6e:2x2x1
jax: 0.10.0
libtpu: 0.0.40
codegen_flags: <defaults>
</compile_context>

<pallas_src>
import functools

import jax
import jax.numpy as jnp
import numpy as np
from jax.experimental import pallas as pl
from jax.experimental.pallas import tpu as pltpu

LN_EPS = 1e-5  # PyTorch nn.LayerNorm default


def _round_up(x, m):
    return ((x + m - 1) // m) * m


def _conv_embed_kernel(patches_ref, w_ref, params_ref, out_ref, *,
                       use_norm, n_true, n_pad):
    """One row tile: (tm, K) @ (K, Np) + bias -> LayerNorm -> store (N, tm).

    Np is the lane-padded (multiple of 128) width; padded columns of W and of
    the packed params are zero.  LayerNorm uses two-pass statistics over the
    TRUE embed_dim (padded columns masked out of the variance), and only the
    first n_true rows of the transposed result are written back.
    params_ref rows: 0 = bias, 1 = gamma, 2 = beta.
    """
    acc = jnp.dot(patches_ref[...], w_ref[...],
                  preferred_element_type=jnp.float32)      # MXU, f32 accumulate
    acc = acc + params_ref[0:1, :]                         # + bias (1, Np)
    if use_norm:
        inv_n = jnp.float32(1.0 / n_true)
        mean = jnp.sum(acc, axis=-1, keepdims=True) * inv_n   # padded cols are 0
        centered = acc - mean
        if n_true != n_pad:
            lane = jax.lax.broadcasted_iota(jnp.int32, acc.shape, 1)
            centered = jnp.where(lane < n_true, centered, 0.0)
        var = jnp.sum(centered * centered, axis=-1, keepdims=True) * inv_n
        acc = centered * jax.lax.rsqrt(var + LN_EPS)       # rsqrt -> EUP slot
        acc = acc * params_ref[1:2, :] + params_ref[2:3, :]   # gamma, beta
    # XLU transpose (free filler here); drop the lane padding before the
    # store so only the true embed_dim columns ever reach HBM.
    out_ref[...] = jnp.transpose(acc)[:n_true, :].astype(out_ref.dtype)


def conv_embed_forward(x, weight, bias, gamma=None, beta=None, *, stride,
                       padding, use_norm=True, tm=2048,
                       compute_dtype=jnp.bfloat16):
    """ConvEmbed.forward: Conv2d(patch_size, stride, padding) + LayerNorm.

    x:      (B, Cin, H, W)      float32, NCHW
    weight: (Cout, Cin, KH, KW) PyTorch OIHW conv weight
    bias:   (Cout,)
    gamma, beta: (Cout,)        LayerNorm affine params (if use_norm)
    returns (B, Cout, Ho, Wo)   NCHW float32, like the PyTorch module
    """
    B, Cin, H, W = x.shape
    Cout, _, KH, KW = weight.shape
    Ho = (H + 2 * padding - KH) // stride + 1
    Wo = (W + 2 * padding - KW) // stride + 1

    # ---- glue: NHWC im2col, layout-preserving reshape ----------------------
    x_nhwc = jnp.transpose(x, (0, 2, 3, 1)).astype(compute_dtype)  # (B,H,W,Cin)
    x_pad = jnp.pad(x_nhwc,
                    ((0, 0), (padding, padding), (padding, padding), (0, 0)))
    cols = []
    for kh in range(KH):
        for kw in range(KW):
            cols.append(jax.lax.slice(
                x_pad,
                (0, kh, kw, 0),
                (B, kh + (Ho - 1) * stride + 1, kw + (Wo - 1) * stride + 1, Cin),
                (1, stride, stride, 1)))                   # (B, Ho, Wo, Cin)
    patches = jnp.stack(cols, axis=3)                      # (B, Ho, Wo, KH*KW, Cin)
    patches = patches.reshape(B * Ho * Wo, KH * KW * Cin)  # no data movement

    M, K = patches.shape
    N = Cout
    Np = _round_up(max(N, 128), 128)                # lane-dense MXU output width
    # tm is the lane dim of the transposed output tile -> multiple of 128.
    # Cap at ~M/2 (rounded up) so grid_m >= 2 and both v7x TCs get work.
    tm_eff = max(128, min(_round_up(tm, 128), _round_up(pl.cdiv(M, 2), 128)))
    grid_m = pl.cdiv(M, tm_eff)                     # ragged last block is masked

    # Weight reordered to match the (kh, kw, cin) ordering of K.
    w_mat = jnp.transpose(weight, (2, 3, 1, 0)).reshape(K, N)
    w_mat = jnp.pad(w_mat, ((0, 0), (0, Np - N))).astype(compute_dtype)

    # bias / gamma / beta packed into one (8, Np) f32 operand (rows 0..2);
    # padded columns stay exactly zero (LN statistics rely on this).
    params = jnp.zeros((8, Np), jnp.float32)
    params = params.at[0, :N].set(bias.astype(jnp.float32))
    if use_norm:
        params = params.at[1, :N].set(gamma.astype(jnp.float32))
        params = params.at[2, :N].set(beta.astype(jnp.float32))

    kernel = functools.partial(_conv_embed_kernel, use_norm=use_norm,
                               n_true=N, n_pad=Np)

    itemsize = np.dtype(compute_dtype).itemsize
    cost = pl.CostEstimate(
        flops=2 * M * K * Np + 10 * M * Np,
        transcendentals=M,
        bytes_accessed=(M * K + K * Np) * itemsize + 8 * Np * 4 + M * N * 4)

    out_t = pl.pallas_call(
        kernel,
        out_shape=jax.ShapeDtypeStruct((N, M), jnp.float32),
        grid_spec=pltpu.PrefetchScalarGridSpec(
            num_scalar_prefetch=0,
            grid=(grid_m,),
            in_specs=[
                pl.BlockSpec((tm_eff, K), lambda i: (i, 0)),  # patch row tile
                pl.BlockSpec((K, Np), lambda i: (0, 0)),      # resident padded W
                pl.BlockSpec((8, Np), lambda i: (0, 0)),      # bias/gamma/beta
            ],
            out_specs=pl.BlockSpec((N, tm_eff), lambda i: (0, i)),  # transposed
        ),
        compiler_params=pltpu.CompilerParams(
            dimension_semantics=("parallel",)),   # megacore shards row tiles
        cost_estimate=cost,
    )(patches, w_mat, params)

    # (Cout, B*Ho*Wo) -> (B, Cout, Ho, Wo): cheap leading-axis transpose
    # (a no-op copy when B == 1).
    return out_t.reshape(N, B, Ho, Wo).transpose(1, 0, 2, 3)


def _reference(x, weight, bias, gamma, beta, *, stride, padding, use_norm=True):
    y = jax.lax.conv_general_dilated(
        x, weight, window_strides=(stride, stride),
        padding=[(padding, padding), (padding, padding)],
        dimension_numbers=("NCHW", "OIHW", "NCHW"))
    y = y + bias[None, :, None, None]
    if use_norm:
        B, C, Ho, Wo = y.shape
        t = y.transpose(0, 2, 3, 1).reshape(B, Ho * Wo, C)
        mean = jnp.mean(t, axis=-1, keepdims=True)
        var = jnp.mean((t - mean) ** 2, axis=-1, keepdims=True)
        t = (t - mean) * jax.lax.rsqrt(var + LN_EPS) * gamma + beta
        y = t.reshape(B, Ho, Wo, C).transpose(0, 3, 1, 2)
    return y


if __name__ == "__main__":
    # ConvEmbed(patch_size=7, in_channels=3, embed_dim=64, stride=4, padding=2,
    #           norm_layer=LayerNorm)  -- small synthetic config.
    B, Cin, H, W = 2, 3, 16, 16
    patch_size, stride, padding, embed_dim = 7, 4, 2, 64

    key = jax.random.PRNGKey(0)
    kx, kw, kb = jax.random.split(key, 3)
    x = jax.random.normal(kx, (B, Cin, H, W), dtype=jnp.float32)
    weight = (jax.random.normal(kw, (embed_dim, Cin, patch_size, patch_size),
                                dtype=jnp.float32)
              * (1.0 / np.sqrt(Cin * patch_size * patch_size)))
    bias = jax.random.normal(kb, (embed_dim,), dtype=jnp.float32) * 0.02
    # LayerNorm params: PyTorch default init (weight=1, bias=0)
    gamma = jnp.ones((embed_dim,), dtype=jnp.float32)
    beta = jnp.zeros((embed_dim,), dtype=jnp.float32)

    # --- f32 compute path: tight check against the f32 reference ------------
    out_f32 = conv_embed_forward(x, weight, bias, gamma, beta,
                                 stride=stride, padding=padding,
                                 use_norm=True, compute_dtype=jnp.float32)
    out_f32 = jax.block_until_ready(out_f32)
    ref = _reference(x, weight, bias, gamma, beta,
                     stride=stride, padding=padding, use_norm=True)
    np.testing.assert_allclose(np.asarray(out_f32), np.asarray(ref),
                               atol=1e-4, rtol=1e-4)

    # --- bf16 compute path (default): check against bf16-quantized-input ref
    out_bf16 = conv_embed_forward(x, weight, bias, gamma, beta,
                                  stride=stride, padding=padding,
                                  use_norm=True)           # compute_dtype=bf16
    out_bf16 = jax.block_until_ready(out_bf16)
    xq = x.astype(jnp.bfloat16).astype(jnp.float32)
    wq = weight.astype(jnp.bfloat16).astype(jnp.float32)
    ref_q = _reference(xq, wq, bias, gamma, beta,
                       stride=stride, padding=padding, use_norm=True)
    np.testing.assert_allclose(np.asarray(out_bf16), np.asarray(ref_q),
                               atol=1e-2, rtol=1e-2)

    assert out_f32.shape == (B, embed_dim, 4, 4)
    assert out_bf16.shape == (B, embed_dim, 4, 4)
    print("KERNEL_OK")
</pallas_src>

<mosaic_0001>
module attributes {stable_mosaic.version = 11 : i64} {
  func.func @_conv_embed_kernel(%arg0: i32, %arg1: memref<128x147xf32, #tpu.memory_space<vmem>>, %arg2: memref<147x128xf32, #tpu.memory_space<vmem>>, %arg3: memref<8x128xf32, #tpu.memory_space<vmem>>, %arg4: memref<64x128xf32, #tpu.memory_space<vmem>>) attributes {dimension_semantics = [#tpu.dimension_semantics<parallel>], iteration_bounds = array<i64: 1>, scalar_prefetch = 0 : i64, scratch_operands = 0 : i64, tpu.core_type = #tpu.core_type<tc>, window_params = [{transform_indices = @transform_0, window_bounds = array<i64: 128, 147>}, {pipeline_mode = #tpu.pipeline_mode<synchronous>, transform_indices = @transform_1, window_bounds = array<i64: 147, 128>}, {pipeline_mode = #tpu.pipeline_mode<synchronous>, transform_indices = @transform_2, window_bounds = array<i64: 8, 128>}, {transform_indices = @transform_3, window_bounds = array<i64: 64, 128>}]} {
    %c0 = arith.constant 0 : index
    %c0_0 = arith.constant 0 : index
    %0 = vector.load %arg1[%c0, %c0_0] : memref<128x147xf32, #tpu.memory_space<vmem>>, vector<128x147xf32>
    %c0_1 = arith.constant 0 : index
    %c0_2 = arith.constant 0 : index
    %1 = vector.load %arg2[%c0_1, %c0_2] : memref<147x128xf32, #tpu.memory_space<vmem>>, vector<147x128xf32>
    %cst = arith.constant dense<0.000000e+00> : vector<128x128xf32>
    %2 = tpu.matmul %0, %1, %cst {dimension_numbers = #tpu.dot_dimension_numbers<[1], [0], [0], [1], [0, 0, 1, 1], [], []>} : vector<128x147xf32>, vector<147x128xf32>, vector<128x128xf32> -> vector<128x128xf32>
    %c0_3 = arith.constant 0 : index
    %c0_4 = arith.constant 0 : index
    %3 = vector.load %arg3[%c0_3, %c0_4] : memref<8x128xf32, #tpu.memory_space<vmem>>, vector<1x128xf32>
    %4 = vector.broadcast %3 : vector<1x128xf32> to vector<128x128xf32>
    %5 = arith.addf %2, %4 : vector<128x128xf32>
    %cst_5 = arith.constant dense<0.000000e+00> : vector<128xf32>
    %6 = vector.multi_reduction <add>, %5, %cst_5 [1] : vector<128x128xf32> to vector<128xf32>
    %7 = vector.shape_cast %6 : vector<128xf32> to vector<128x1xf32>
    %cst_6 = arith.constant 1.562500e-02 : f32
    %8 = vector.broadcast %cst_6 : f32 to vector<128x1xf32>
    %9 = arith.mulf %7, %8 : vector<128x1xf32>
    %10 = vector.broadcast %9 : vector<128x1xf32> to vector<128x128xf32>
    %11 = arith.subf %5, %10 : vector<128x128xf32>
    %12 = tpu.iota {dimensions = array<i32: 1>} : vector<128x128xi32>
    %c64_i32 = arith.constant 64 : i32
    %13 = vector.broadcast %c64_i32 : i32 to vector<128x128xi32>
    %14 = arith.cmpi slt, %12, %13 : vector<128x128xi32>
    %cst_7 = arith.constant 0.000000e+00 : f32
    %15 = vector.broadcast %cst_7 : f32 to vector<128x128xf32>
    %16 = arith.select %14, %11, %15 : vector<128x128xi1>, vector<128x128xf32>
    %17 = arith.mulf %16, %16 : vector<128x128xf32>
    %cst_8 = arith.constant dense<0.000000e+00> : vector<128xf32>
    %18 = vector.multi_reduction <add>, %17, %cst_8 [1] : vector<128x128xf32> to vector<128xf32>
    %19 = vector.shape_cast %18 : vector<128xf32> to vector<128x1xf32>
    %cst_9 = arith.constant 1.562500e-02 : f32
    %20 = vector.broadcast %cst_9 : f32 to vector<128x1xf32>
    %21 = arith.mulf %19, %20 : vector<128x1xf32>
    %cst_10 = arith.constant 9.99999974E-6 : f32
    %22 = vector.broadcast %cst_10 : f32 to vector<128x1xf32>
    %23 = arith.addf %21, %22 : vector<128x1xf32>
    %24 = math.rsqrt %23 : vector<128x1xf32>
    %25 = vector.broadcast %24 : vector<128x1xf32> to vector<128x128xf32>
    %26 = arith.mulf %16, %25 : vector<128x128xf32>
    %c1 = arith.constant 1 : index
    %c0_11 = arith.constant 0 : index
    %27 = vector.load %arg3[%c1, %c0_11] : memref<8x128xf32, #tpu.memory_space<vmem>>, vector<1x128xf32>
    %28 = vector.broadcast %27 : vector<1x128xf32> to vector<128x128xf32>
    %29 = arith.mulf %26, %28 : vector<128x128xf32>
    %c2 = arith.constant 2 : index
    %c0_12 = arith.constant 0 : index
    %30 = vector.load %arg3[%c2, %c0_12] : memref<8x128xf32, #tpu.memory_space<vmem>>, vector<1x128xf32>
    %31 = vector.broadcast %30 : vector<1x128xf32> to vector<128x128xf32>
    %32 = arith.addf %29, %31 : vector<128x128xf32>
    %33 = tpu.transpose %32, [1, 0] : vector<128x128xf32> -> vector<128x128xf32>
    %34 = vector.extract_strided_slice %33 {offsets = [0, 0], sizes = [64, 128], strides = [1, 1]} : vector<128x128xf32> to vector<64x128xf32>
    %c0_13 = arith.constant 0 : index
    %c0_14 = arith.constant 0 : index
    %35 = vector.load %arg4[%c0_13, %c0_14] : memref<64x128xf32, #tpu.memory_space<vmem>>, vector<64x128xf32>
    tpu.vector_store %arg4[%c0_13, %c0_14], %34 {strides = array<i32>} : memref<64x128xf32, #tpu.memory_space<vmem>>, vector<64x128xf32>,
    return
  }
  func.func @transform_0(%arg0: i32) -> (i32, i32) {
    %c0_i32 = arith.constant 0 : i32
    %c0_i32_0 = arith.constant 0 : i32
    return %arg0, %c0_i32 : i32, i32
  }
  func.func @transform_1(%arg0: i32) -> (i32, i32) {
    %c0_i32 = arith.constant 0 : i32
    %c0_i32_0 = arith.constant 0 : i32
    %c0_i32_1 = arith.constant 0 : i32
    return %c0_i32, %c0_i32_0 : i32, i32
  }
  func.func @transform_2(%arg0: i32) -> (i32, i32) {
    %c0_i32 = arith.constant 0 : i32
    %c0_i32_0 = arith.constant 0 : i32
    %c0_i32_1 = arith.constant 0 : i32
    return %c0_i32, %c0_i32_0 : i32, i32
  }
  func.func @transform_3(%arg0: i32) -> (i32, i32) {
    %c0_i32 = arith.constant 0 : i32
    %c0_i32_0 = arith.constant 0 : i32
    return %c0_i32, %arg0 : i32, i32
  }
}

</mosaic_0001>

<bundles_post_ra>
// kernel: tpu_custom_call.1
= control target key start
LH: loop header
LB: loop body
LE: loop exit
PB: predicated region body
PF: predicated region fallthrough
CT: control target
= control target key end

     0   :  { %8 = vsyncpa [#allocation3], 0  ;;  %s1096_s0 = inlined_call_operand.hbm [shape: f32[32,147], index: 0, kind: input, shape index: {}]   ;;  %s1097_s1 = inlined_call_operand.hbm [shape: f32[147,128], index: 1, kind: input, shape index: {}]   ;;  %s1098_s2 = inlined_call_operand.hbm [shape: f32[8,128], index: 2, kind: input, shape index: {}]   ;;  %s1099_s3 = inlined_call_operand.vmem [shape: f32[64,32], index: 3, kind: output, shape index: {}]  }
   0x1   :  { %9 = vsyncpa [#allocation5], 0 }
   0x2   :  { %14 = vsyncadd [#allocation3], 3072  ;;  %s752_s12 = smov [#allocation4]  }
   0x3   :  { %s27_s13 = sshll.u32 %s752_s12, 4  ;;  %s28_s13 = int_to_ptr.vmem [resolvable:$true] %s27_s13 }
   0x4   :  { %s696_s14 = scalar_lea.vmem %s28_s13, 2432  ;;  %p701_p1 = scmp.lt.s32.totalorder %s28_s13, %s28_s13 }
   0x5   :  { %p697_p0 = scmp.ne.s32.totalorder %s28_s13, %s696_s14  ;;  %p702_p2 = scmp.lt.s32.totalorder %s696_s14, %s696_s14 }
   0x7   :  { %p703_p3 = por %p702_p2, %p701_p1 }
   0x9   :  { %p704_p4 = pnand %p703_p3, %p697_p0 }
   0xb   :  { %707 = shalt.err (!%p704_p4)
}
   0xc   :  { %s753_s15 = smov 128   ;;  %s754_s16 = smov 8  }
   0xd   :  { %33 = dma.hbm_to_vmem [thread:$0]  %s1097_s1, 2432, %s28_s13, [#allocation5], %s753_s15, %s753_s15, %s754_s16  }
   0xe   :  { %s755_s19 = smov [#allocation2]  }
   0xf   :  { %s15_s20 = sshll.u32 %s755_s19, 4  ;;  %s16_s20 = int_to_ptr.vmem [resolvable:$true] %s15_s20 }
  0x10   :  { %s716_s21 = scalar_lea.vmem %s16_s20, 1024  ;;  %s720_s22 = scalar_lea.vmem %s16_s20, 4096 }
  0x11   :  { %p717_p5 = scmp.ne.s32.totalorder %s16_s20, %s716_s21  ;;  %p721_p6 = scmp.lt.s32.totalorder %s16_s20, %s16_s20 }
  0x12   :  { %p722_p7 = scmp.lt.s32.totalorder %s720_s22, %s716_s21 }
  0x14   :  { %p723_p8 = por %p722_p7, %p721_p6 }
  0x16   :  { %p724_p9 = pnand %p723_p8, %p717_p5 }
  0x18   :  { %727 = shalt.err (!%p724_p9)
}
  0x19   :  { %s756_s23 = smov 256   ;;  %s757_s24 = smov 16  }
  0x1a   :  { %21 = dma.hbm_to_vmem [thread:$0]  %s1096_s0, 1024, %s16_s20, [#allocation3], %s756_s23, %s756_s23, %s757_s24  }
  0x1b   :  { %s758_s27 = smov [#allocation6]  }
  0x1c   :  { %s40_s28 = sshll.u32 %s758_s27, 4  ;;  %s41_s28 = int_to_ptr.vmem [resolvable:$true] %s40_s28 }
  0x1d   :  { %s736_s1 = scalar_lea.vmem %s41_s28, 128  ;;  %p741_p11 = scmp.lt.s32.totalorder %s41_s28, %s41_s28 }
  0x1e   :  { %p737_p10 = scmp.ne.s32.totalorder %s41_s28, %s736_s1  ;;  %p742_p12 = scmp.lt.s32.totalorder %s736_s1, %s736_s1 }
  0x20   :  { %p743_p13 = por %p742_p12, %p741_p11 }
  0x22   :  { %p744_p0 = pnand %p743_p13, %p737_p10 }
  0x24   :  { %747 = shalt.err (!%p744_p0)
}
  0x25   :  { %43 = dma.hbm_to_vmem [thread:$0]  %s1098_s2, 128, %s41_s28, [#allocation5]  }
  0x26   :  { %748 = dma.done.wait [#allocation3], 4096  }
  0x27   :  { %749 = vsyncadd [#allocation3], 4294963200 }
  0x28   :  { %750 = dma.done.wait [#allocation5], 2560  }
  0x29   :  { %751 = vsyncadd [#allocation5], 4294964736  ;;  %v759_v0 = vmov 0.0   ;;  %v100_v1 = vld [vmem:[#allocation4 + $0x78] sm:$0xff]  ;;  %v99_v2 = vld [vmem:[#allocation4 + $0x70] sm:$0xff]  ;;  %vm109_vm0 = vcmask 154624  }
  0x2a   :  { %162 = vmatprep.subr.mxu0 %v759_v0  ;;  %610 = vmatprep.subr.mxu1 %v759_v0  ;;  %v98_v3 = vld [vmem:[#allocation4 + $0x68] sm:$0xff]  ;;  %v97_v4 = vld [vmem:[#allocation4 + $0x60] sm:$0xff]  ;;  %v96_v5 = vld [vmem:[#allocation4 + $0x58] sm:$0xff]  ;;  %vm158_vm1 = vcmask 1042432  }
  0x2b   :  { %163 = vmatpush1.msra.mxu0 %v100_v1  ;;  %629 = vmatpush1.msra.mxu1 %v100_v1  ;;  %v95_v6 = vld [vmem:[#allocation4 + $0x50] sm:$0xff]  ;;  %v94_v7 = vld [vmem:[#allocation4 + $0x48] sm:$0xff]  ;;  %v93_v8 = vld [vmem:[#allocation4 + $0x40] sm:$0xff] }
  0x2c   :  { %164 = vmatprep.subr.mxu0 %v759_v0  ;;  %611 = vmatprep.subr.mxu1 %v759_v0  ;;  %v92_v9 = vld [vmem:[#allocation4 + $0x38] sm:$0xff]  ;;  %v91_v10 = vld [vmem:[#allocation4 + $0x30] sm:$0xff]  ;;  %v90_v11 = vld [vmem:[#allocation4 + $0x28] sm:$0xff] }
  0x2d   :  { %165 = vmatpush1.msra.mxu0 %v99_v2  ;;  %630 = vmatpush1.msra.mxu1 %v99_v2  ;;  %v54_v12 = vld [vmem:[#allocation2 + $0x8] sm:$0xff]  ;;  %v89_v13 = vld [vmem:[#allocation4 + $0x20] sm:$0xff]  ;;  %v88_v14 = vld [vmem:[#allocation4 + $0x18] sm:$0xff] }
  0x2e   :  { %166 = vmatprep.subr.mxu0 %v759_v0  ;;  %612 = vmatprep.subr.mxu1 %v759_v0  ;;  %v87_v15 = vld [vmem:[#allocation4 + $0x10] sm:$0xff]  ;;  %v86_v16 = vld [vmem:[#allocation4 + $0x8] sm:$0xff]  ;;  %v85_v17 = vld [vmem:[#allocation4] sm:$0xff] }
  0x2f   :  { %167 = vmatpush1.msra.mxu0 %v98_v3  ;;  %631 = vmatpush1.msra.mxu1 %v98_v3  ;;  %v103_v18 = vld [vmem:[#allocation4 + $0x90] sm:$0x7]  ;;  %v102_v19 = vld [vmem:[#allocation4 + $0x88] sm:$0xff]  ;;  %v101_v20 = vld [vmem:[#allocation4 + $0x80] sm:$0xff] }
  0x30   :  { %168 = vmatprep.subr.mxu0 %v759_v0  ;;  %613 = vmatprep.subr.mxu1 %v759_v0  ;;  %v53_v21 = vld [vmem:[#allocation2] sm:$0xff]  ;;  %v56_v22 = vld [vmem:[#allocation2 + $0x18] sm:$0xff]  ;;  %v70_v23 = vld [vmem:[#allocation2 + $0x88] sm:$0xff] }
  0x31   :  { %169 = vmatpush1.msra.mxu0 %v97_v4  ;;  %632 = vmatpush1.msra.mxu1 %v97_v4  ;;  %v69_v24 = vld [vmem:[#allocation2 + $0x80] sm:$0xff]  ;;  %v72_v25 = vld [vmem:[#allocation2 + $0x98] sm:$0xff]  ;;  %v55_v26 = vld [vmem:[#allocation2 + $0x10] sm:$0xff] }
  0x32   :  { %170 = vmatprep.subr.mxu0 %v759_v0  ;;  %614 = vmatprep.subr.mxu1 %v759_v0  ;;  %v58_v27 = vld [vmem:[#allocation2 + $0x28] sm:$0xff]  ;;  %v71_v28 = vld [vmem:[#allocation2 + $0x90] sm:$0xff]  ;;  %v57_v30 = vld [vmem:[#allocation2 + $0x20] sm:$0xff] }
  0x33   :  { %171 = vmatpush1.msra.mxu0 %v96_v5  ;;  %633 = vmatpush1.msra.mxu1 %v96_v5  ;;  %v74_v29 = vld [vmem:[#allocation2 + $0xa8] sm:$0xff]  ;;  %v60_v31 = vld [vmem:[#allocation2 + $0x38] sm:$0xff]  ;;  %v73_v32 = vld [vmem:[#allocation2 + $0xa0] sm:$0xff] }
  0x34   :  { %172 = vmatprep.subr.mxu0 %v759_v0  ;;  %615 = vmatprep.subr.mxu1 %v759_v0  ;;  %v76_v33 = vld [vmem:[#allocation2 + $0xb8] sm:$0xff]  ;;  %v59_v34 = vld [vmem:[#allocation2 + $0x30] sm:$0xff]  ;;  %v62_v35 = vld [vmem:[#allocation2 + $0x48] sm:$0xff] }
  0x35   :  { %173 = vmatpush1.msra.mxu0 %v95_v6  ;;  %634 = vmatpush1.msra.mxu1 %v95_v6  ;;  %v75_v36 = vld [vmem:[#allocation2 + $0xb0] sm:$0xff]  ;;  %v78_v37 = vld [vmem:[#allocation2 + $0xc8] sm:$0xff]  ;;  %v61_v38 = vld [vmem:[#allocation2 + $0x40] sm:$0xff] }
  0x36   :  { %174 = vmatprep.subr.mxu0 %v759_v0  ;;  %616 = vmatprep.subr.mxu1 %v759_v0  ;;  %v64_v39 = vld [vmem:[#allocation2 + $0x58] sm:$0xff]  ;;  %v77_v40 = vld [vmem:[#allocation2 + $0xc0] sm:$0xff]  ;;  %v63_v42 = vld [vmem:[#allocation2 + $0x50] sm:$0xff] }
  0x37   :  { %175 = vmatpush1.msra.mxu0 %v94_v7  ;;  %635 = vmatpush1.msra.mxu1 %v94_v7  ;;  %v80_v41 = vld [vmem:[#allocation2 + $0xd8] sm:$0xff]  ;;  %v66_v43 = vld [vmem:[#allocation2 + $0x68] sm:$0xff]  ;;  %v79_v44 = vld [vmem:[#allocation2 + $0xd0] sm:$0xff] }
  0x38   :  { %176 = vmatprep.subr.mxu0 %v759_v0  ;;  %617 = vmatprep.subr.mxu1 %v759_v0  ;;  %v82_v45 = vld [vmem:[#allocation2 + $0xe8] sm:$0xff]  ;;  %v65_v46 = vld [vmem:[#allocation2 + $0x60] sm:$0xff]  ;;  %v68_v47 = vld [vmem:[#allocation2 + $0x78] sm:$0xff] }
  0x39   :  { %177 = vmatpush1.msra.mxu0 %v93_v8  ;;  %636 = vmatpush1.msra.mxu1 %v93_v8  ;;  %v81_v48 = vld [vmem:[#allocation2 + $0xe0] sm:$0xff]  ;;  %v84_v49 = vld [vmem:[#allocation2 + $0xf8] sm:$0xff]  ;;  %v67_v50 = vld [vmem:[#allocation2 + $0x70] sm:$0xff] }
  0x3a   :  { %178 = vmatprep.subr.mxu0 %v759_v0  ;;  %618 = vmatprep.subr.mxu1 %v759_v0  ;;  %v83_v51 = vld [vmem:[#allocation2 + $0xf0] sm:$0xff]  ;;  %v843_v52 = vld [vmem:[#allocation6] ss:$0 sm:$0xff] }
  0x3b   :  { %179 = vmatpush1.msra.mxu0 %v92_v9  ;;  %637 = vmatpush1.msra.mxu1 %v92_v9 }
  0x3c   :  { %180 = vmatprep.subr.mxu0 %v759_v0  ;;  %619 = vmatprep.subr.mxu1 %v759_v0 }
  0x3d   :  { %181 = vmatpush1.msra.mxu0 %v91_v10  ;;  %638 = vmatpush1.msra.mxu1 %v91_v10 }
  0x3e   :  { %182 = vmatprep.subr.mxu0 %v759_v0  ;;  %620 = vmatprep.subr.mxu1 %v759_v0 }
  0x3f   :  { %183 = vmatpush1.msra.mxu0 %v90_v11  ;;  %639 = vmatpush1.msra.mxu1 %v90_v11 }
  0x40   :  { %184 = vmatprep.subr.mxu0 %v759_v0  ;;  %592 = vmatprep.mubr.msk.f32.mxu0 %vm109_vm0, %v54_v12 }
  0x41   :  { %185 = vmatpush1.msra.mxu0 %v89_v13  ;;  %621 = vmatprep.subr.mxu1 %v759_v0 }
  0x42   :  { %186 = vmatprep.subr.mxu0 %v759_v0  ;;  %640 = vmatpush1.msra.mxu1 %v89_v13 }
  0x43   :  { %187 = vmatpush1.msra.mxu0 %v88_v14  ;;  %622 = vmatprep.subr.mxu1 %v759_v0 }
  0x44   :  { %188 = vmatprep.subr.mxu0 %v759_v0  ;;  %641 = vmatpush1.msra.mxu1 %v88_v14 }
  0x45   :  { %189 = vmatpush1.msra.mxu0 %v87_v15  ;;  %623 = vmatprep.subr.mxu1 %v759_v0 }
  0x46   :  { %190 = vmatprep.subr.mxu0 %v759_v0  ;;  %642 = vmatpush1.msra.mxu1 %v87_v15 }
  0x47   :  { %191 = vmatpush1.msra.mxu0 %v86_v16  ;;  %624 = vmatprep.subr.mxu1 %v759_v0 }
  0x48   :  { %192 = vmatprep.subr.mxu0 %v759_v0  ;;  %643 = vmatpush1.msra.mxu1 %v86_v16 }
  0x49   :  { %193 = vmatpush1.msra.mxu0 %v85_v17  ;;  %625 = vmatprep.subr.mxu1 %v759_v0 }
  0x4a   :  { %220 = vmatprep.subr.mxu0 %v759_v0  ;;  %644 = vmatpush1.msra.mxu1 %v85_v17 }
  0x4b   :  { %591 = vmatpush2.msk.msra.mxu0 %vm158_vm1, %v103_v18  ;;  %626 = vmatprep.subr.mxu1 %v759_v0 }
  0x4c   :  { %222 = vmatprep.subr.mxu0 %v759_v0  ;;  %645 = vmatpush2.msk.msra.mxu1 %vm158_vm1, %v103_v18 }
  0x4d   :  { %223 = vmatpush2.msra.mxu0 %v102_v19  ;;  %627 = vmatprep.subr.mxu1 %v759_v0 }
  0x4e   :  { %224 = vmatprep.subr.mxu0 %v759_v0  ;;  %646 = vmatpush2.msra.mxu1 %v102_v19 }
  0x4f   :  { %225 = vmatpush2.msra.mxu0 %v101_v20  ;;  %628 = vmatprep.subr.mxu1 %v759_v0 }
  0x50   :  { %227 = vmatmul.mubr.f32.vlgmr.msra.gmra.mxu0 %v53_v21  ;;  %647 = vmatpush2.msra.mxu1 %v101_v20 }
  0x51   :  { %593 = vmatprep.mubr.msk.f32.mxu0 %vm109_vm0, %v56_v22  ;;  %600 = vmatprep.mubr.msk.f32.mxu1 %vm109_vm0, %v70_v23 }
  0x52   :  { %267 = vmatmul.mubr.f32.vlgmr.msra.gmra.mxu1 %v69_v24 }
  0x53   :  { %601 = vmatprep.mubr.msk.f32.mxu1 %vm109_vm0, %v72_v25 }
  0x54   :  { %232 = vmatmul.mubr.f32.gmra.mxu0 %v55_v26 }
  0x55   :  { %594 = vmatprep.mubr.msk.f32.mxu0 %vm109_vm0, %v58_v27 }
  0x56   :  { %272 = vmatmul.mubr.f32.gmra.mxu1 %v71_v28 }
  0x57   :  { %602 = vmatprep.mubr.msk.f32.mxu1 %vm109_vm0, %v74_v29 }
  0x58   :  { %237 = vmatmul.mubr.f32.gmra.mxu0 %v57_v30 }
  0x59   :  { %595 = vmatprep.mubr.msk.f32.mxu0 %vm109_vm0, %v60_v31 }
  0x5a   :  { %277 = vmatmul.mubr.f32.gmra.mxu1 %v73_v32 }
  0x5b   :  { %603 = vmatprep.mubr.msk.f32.mxu1 %vm109_vm0, %v76_v33 }
  0x5c   :  { %242 = vmatmul.mubr.f32.gmra.mxu0 %v59_v34 }
  0x5d   :  { %596 = vmatprep.mubr.msk.f32.mxu0 %vm109_vm0, %v62_v35 }
  0x5e   :  { %282 = vmatmul.mubr.f32.gmra.mxu1 %v75_v36 }
  0x5f   :  { %604 = vmatprep.mubr.msk.f32.mxu1 %vm109_vm0, %v78_v37  ;;  %v371_v37 = vlaneseq }
  0x60   :  { %247 = vmatmul.mubr.f32.gmra.mxu0 %v61_v38 }
  0x61   :  { %597 = vmatprep.mubr.msk.f32.mxu0 %vm109_vm0, %v64_v39  ;;  %v906_v38 = vand.u32 127, %v371_v37 }
  0x62   :  { %287 = vmatmul.mubr.f32.gmra.mxu1 %v77_v40 }
  0x63   :  { %605 = vmatprep.mubr.msk.f32.mxu1 %vm109_vm0, %v80_v41  ;;  %vm373_vm2 = vcmp.lt.s32.totalorder %v906_v38, 64 }
  0x64   :  { %252 = vmatmul.mubr.f32.gmra.mxu0 %v63_v42 }
  0x65   :  { %598 = vmatprep.mubr.msk.f32.mxu0 %vm109_vm0, %v66_v43 }
  0x66   :  { %292 = vmatmul.mubr.f32.gmra.mxu1 %v79_v44 }
  0x67   :  { %606 = vmatprep.mubr.msk.f32.mxu1 %vm109_vm0, %v82_v45 }
  0x68   :  { %257 = vmatmul.mubr.f32.gmra.mxu0 %v65_v46 }
  0x69   :  { %599 = vmatprep.mubr.msk.f32.mxu0 %vm109_vm0, %v68_v47 }
  0x6a   :  { %297 = vmatmul.mubr.f32.gmra.mxu1 %v81_v48 }
  0x6b   :  { %607 = vmatprep.mubr.msk.f32.mxu1 %vm109_vm0, %v84_v49 }
  0x6c   :  { %262 = vmatmul.mubr.f32.gmra.mxu0 %v67_v50 }
  0x6e   :  { %302 = vmatmul.mubr.f32.gmra.mxu1 %v83_v51 }
 0x110   :  { %v228_v53 = vpop.f32.mrf.mxu0 }
 0x111   :  { %v846_v54 = vadd.f32 %v843_v52, %v228_v53 }
 0x112   :  { %v230_v55 = vpop.f32.mrf.mxu0  ;;  %v268_v56 = vpop.f32.mrf.mxu1 }
 0x113   :  { %307 = vadd.xlane.f32.xlu0 %v846_v54  ;;  %v870_v23 = vadd.f32 %v843_v52, %v268_v56 }
 0x114   :  { %v233_v57 = vpop.f32.mrf.mxu0  ;;  %v270_v58 = vpop.f32.mrf.mxu1 }
 0x115   :  { %v850_v59 = vadd.f32 %v843_v52, %v233_v57 }
 0x116   :  { %v235_v60 = vpop.f32.mrf.mxu0  ;;  %v273_v61 = vpop.f32.mrf.mxu1 }
 0x117   :  { %309 = vadd.xlane.f32.xlu0 %v850_v59  ;;  %v877_v29 = vadd.f32 %v843_v52, %v273_v61 }
 0x118   :  { %v238_v62 = vpop.f32.mrf.mxu0  ;;  %v275_v63 = vpop.f32.mrf.mxu1 }
 0x119   :  { %v854_v0 = vadd.f32 %v843_v52, %v238_v62 }
 0x11a   :  { %v240_v1 = vpop.f32.mrf.mxu0  ;;  %v278_v2 = vpop.f32.mrf.mxu1 }
 0x11b   :  { %311 = vadd.xlane.f32.xlu1 %v854_v0  ;;  %v880_v30 = vadd.f32 %v843_v52, %v278_v2 }
 0x11c   :  { %v243_v3 = vpop.f32.mrf.mxu0  ;;  %v280_v4 = vpop.f32.mrf.mxu1 }
 0x11d   :  { %v858_v5 = vadd.f32 %v843_v52, %v243_v3 }
 0x11e   :  { %v245_v6 = vpop.f32.mrf.mxu0  ;;  %v283_v7 = vpop.f32.mrf.mxu1 }
 0x11f   :  { %313 = vadd.xlane.f32.xlu1 %v858_v5  ;;  %v885_v32 = vadd.f32 %v843_v52, %v283_v7 }
 0x120   :  { %v248_v8 = vpop.f32.mrf.mxu0  ;;  %v285_v9 = vpop.f32.mrf.mxu1 }
 0x121   :  { %v862_v10 = vadd.f32 %v843_v52, %v248_v8 }
 0x122   :  { %v250_v11 = vpop.f32.mrf.mxu0  ;;  %v288_v12 = vpop.f32.mrf.mxu1 }
 0x123   :  { %315 = vadd.xlane.f32.xlu0 %v862_v10  ;;  %v888_v33 = vadd.f32 %v843_v52, %v288_v12 }
 0x124   :  { %v253_v13 = vpop.f32.mrf.mxu0  ;;  %v290_v14 = vpop.f32.mrf.mxu1 }
 0x125   :  { %v254_v15 = vadd.f32 %v843_v52, %v253_v13 }
 0x126   :  { %v255_v16 = vpop.f32.mrf.mxu0  ;;  %v293_v17 = vpop.f32.mrf.mxu1 }
 0x127   :  { %317 = vadd.xlane.f32.xlu1 %v254_v15  ;;  %v893_v34 = vadd.f32 %v843_v52, %v293_v17 }
 0x128   :  { %v258_v18 = vpop.f32.mrf.mxu0  ;;  %v295_v19 = vpop.f32.mrf.mxu1 }
 0x129   :  { %v867_v20 = vadd.f32 %v843_v52, %v258_v18 }
 0x12a   :  { %v260_v21 = vpop.f32.mrf.mxu0  ;;  %v298_v22 = vpop.f32.mrf.mxu1 }
 0x12b   :  { %319 = vadd.xlane.f32.xlu0 %v867_v20  ;;  %v898_v35 = vadd.f32 %v843_v52, %v298_v22 }
 0x12c   :  { %v263_v24 = vpop.f32.mrf.mxu0  ;;  %v300_v25 = vpop.f32.mrf.mxu1 }
 0x12d   :  { %v874_v26 = vadd.f32 %v843_v52, %v263_v24 }
 0x12e   :  { %v303_v27 = vpop.f32.mrf.mxu1  ;;  %v265_v28 = vpop.f32.mrf.mxu0 }
 0x12f   :  { %321 = vadd.xlane.f32.xlu1 %v874_v26  ;;  %323 = vadd.xlane.f32.xlu0 %v870_v23  ;;  %v903_v36 = vadd.f32 %v843_v52, %v303_v27 }
 0x130   :  { %v305_v31 = vpop.f32.mrf.mxu1 }
 0x133   :  { %325 = vadd.xlane.f32.xlu1 %v877_v29  ;;  %327 = vadd.xlane.f32.xlu0 %v880_v30 }
 0x137   :  { %329 = vadd.xlane.f32.xlu1 %v885_v32  ;;  %331 = vadd.xlane.f32.xlu0 %v888_v33 }
 0x13b   :  { %333 = vadd.xlane.f32.xlu1 %v893_v34  ;;  %335 = vadd.xlane.f32.xlu0 %v898_v35 }
 0x13f   :  { %337 = vadd.xlane.f32.xlu1 %v903_v36 }
 0x19c   :  { %v308_v39 = vpop.xlane.xlu0 %307 }
 0x19d   :  { %v339_v40 = vmul.f32 0.015625, %v308_v39 }
 0x19f   :  { %v355_v41 = vsub.f32 %v846_v54, %v339_v40 }
 0x1a0   :  { %v310_v42 = vpop.xlane.xlu0 %309 }
 0x1a1   :  { %v340_v43 = vmul.f32 0.015625, %v310_v42  ;;  %v912_v44 = vsel %vm373_vm2, %v355_v41, 0.0 }
 0x1a2   :  { %v390_v45 = vmul.f32 %v912_v44, %v912_v44 }
 0x1a3   :  { %v356_v46 = vsub.f32 %v850_v59, %v340_v43 }
 0x1a4   :  { %v312_v47 = vpop.xlane.xlu1 %311  ;;  %406 = vadd.xlane.f32.xlu0 %v390_v45 }
 0x1a5   :  { %v919_v48 = vsel %vm373_vm2, %v356_v46, 0.0  ;;  %v341_v62 = vmul.f32 0.015625, %v312_v47 }
 0x1a6   :  { %v391_v49 = vmul.f32 %v919_v48, %v919_v48 }
 0x1a7   :  { %v357_v4 = vsub.f32 %v854_v0, %v341_v62 }
 0x1a8   :  { %v314_v50 = vpop.xlane.xlu1 %313  ;;  %408 = vadd.xlane.f32.xlu1 %v391_v49 }
 0x1a9   :  { %v342_v51 = vmul.f32 0.015625, %v314_v50  ;;  %v955_v18 = vsel %vm373_vm2, %v357_v4, 0.0  ;;  %v1020_v4 = vld [vmem:[#allocation6 + $0x1] ss:$0 sm:$0xff] }
 0x1ab   :  { %v358_v52 = vsub.f32 %v858_v5, %v342_v51 }
 0x1ac   :  { %v316_v55 = vpop.xlane.xlu0 %315 }
 0x1ad   :  { %v926_v53 = vsel %vm373_vm2, %v358_v52, 0.0  ;;  %v343_v5 = vmul.f32 0.015625, %v316_v55 }
 0x1ae   :  { %v393_v54 = vmul.f32 %v926_v53, %v926_v53 }
 0x1b0   :  { %v318_v56 = vpop.xlane.xlu1 %317  ;;  %412 = vadd.xlane.f32.xlu1 %v393_v54 }
 0x1b1   :  { %v344_v57 = vmul.f32 0.015625, %v318_v56 }
 0x1b3   :  { %v360_v58 = vsub.f32 %v254_v15, %v344_v57  ;;  %v359_v15 = vsub.f32 %v862_v10, %v343_v5  ;;  %v392_v10 = vmul.f32 %v955_v18, %v955_v18 }
 0x1b4   :  { %v320_v59 = vpop.xlane.xlu0 %319 }
 0x1b5   :  { %v932_v60 = vsel %vm373_vm2, %v360_v58, 0.0  ;;  %v345_v16 = vmul.f32 0.015625, %v320_v59  ;;  %v969_v28 = vsel %vm373_vm2, %v359_v15, 0.0 }
 0x1b6   :  { %v395_v61 = vmul.f32 %v932_v60, %v932_v60 }
 0x1b7   :  { %v361_v25 = vsub.f32 %v867_v20, %v345_v16  ;;  %v394_v20 = vmul.f32 %v969_v28, %v969_v28 }
 0x1b8   :  { %v322_v63 = vpop.xlane.xlu1 %321  ;;  %416 = vadd.xlane.f32.xlu1 %v395_v61  ;;  %v324_v1 = vpop.xlane.xlu0 %323 }
 0x1b9   :  { %v346_v2 = vmul.f32 0.015625, %v322_v63  ;;  %v347_v3 = vmul.f32 0.015625, %v324_v1  ;;  %v983_v42 = vsel %vm373_vm2, %v361_v25, 0.0 }
 0x1bb   :  { %v362_v6 = vsub.f32 %v874_v26, %v346_v2  ;;  %v363_v7 = vsub.f32 %v870_v23, %v347_v3 }
 0x1bc   :  { %v326_v8 = vpop.xlane.xlu1 %325  ;;  %v328_v9 = vpop.xlane.xlu0 %327 }
 0x1bd   :  { %v348_v11 = vmul.f32 0.015625, %v326_v8  ;;  %v941_v12 = vsel %vm373_vm2, %v362_v6, 0.0  ;;  %v945_v13 = vsel %vm373_vm2, %v363_v7, 0.0  ;;  %v349_v26 = vmul.f32 0.015625, %v328_v9  ;;  %v1023_v6 = vld [vmem:[#allocation6 + $0x2] ss:$0 sm:$0xff] }
 0x1be   :  { %v397_v14 = vmul.f32 %v941_v12, %v941_v12  ;;  %v398_v0 = vmul.f32 %v945_v13, %v945_v13 }
 0x1bf   :  { %v364_v17 = vsub.f32 %v877_v29, %v348_v11 }
 0x1c0   :  { %v330_v19 = vpop.xlane.xlu1 %329  ;;  %420 = vadd.xlane.f32.xlu1 %v397_v14  ;;  %422 = vadd.xlane.f32.xlu0 %v398_v0  ;;  %v332_v23 = vpop.xlane.xlu0 %331 }
 0x1c1   :  { %v350_v21 = vmul.f32 0.015625, %v330_v19  ;;  %v959_v22 = vsel %vm373_vm2, %v364_v17, 0.0  ;;  %v351_v40 = vmul.f32 0.015625, %v332_v23 }
 0x1c2   :  { %v399_v24 = vmul.f32 %v959_v22, %v959_v22 }
 0x1c3   :  { %v366_v27 = vsub.f32 %v885_v32, %v350_v21  ;;  %v365_v32 = vsub.f32 %v880_v30, %v349_v26  ;;  %v396_v30 = vmul.f32 %v983_v42, %v983_v42 }
 0x1c4   :  { %v334_v29 = vpop.xlane.xlu1 %333  ;;  %424 = vadd.xlane.f32.xlu1 %v399_v24  ;;  %410 = vadd.xlane.f32.xlu0 %v392_v10  ;;  %v336_v43 = vpop.xlane.xlu0 %335 }
 0x1c5   :  { %v352_v31 = vmul.f32 0.015625, %v334_v29  ;;  %v973_v37 = vsel %vm373_vm2, %v366_v27, 0.0  ;;  %v353_v50 = vmul.f32 0.015625, %v336_v43  ;;  %v997_v52 = vsel %vm373_vm2, %v365_v32, 0.0 }
 0x1c6   :  { %v401_v39 = vmul.f32 %v973_v37, %v973_v37  ;;  %v400_v56 = vmul.f32 %v997_v52, %v997_v52 }
 0x1c7   :  { %v368_v41 = vsub.f32 %v893_v34, %v352_v31  ;;  %v367_v34 = vsub.f32 %v888_v33, %v351_v40  ;;  %v369_v33 = vsub.f32 %v898_v35, %v353_v50 }
 0x1c8   :  { %v338_v45 = vpop.xlane.xlu1 %337  ;;  %428 = vadd.xlane.f32.xlu1 %v401_v39  ;;  %414 = vadd.xlane.f32.xlu0 %v394_v20 }
 0x1c9   :  { %v354_v46 = vmul.f32 0.015625, %v338_v45  ;;  %v987_v47 = vsel %vm373_vm2, %v368_v41, 0.0  ;;  %v1016_v58 = vsel %vm373_vm2, %v369_v33, 0.0 }
 0x1ca   :  { %v403_v49 = vmul.f32 %v987_v47, %v987_v47  ;;  %v404_v59 = vmul.f32 %v1016_v58, %v1016_v58 }
 0x1cb   :  { %v370_v51 = vsub.f32 %v903_v36, %v354_v46  ;;  %v1010_v36 = vsel %vm373_vm2, %v367_v34, 0.0 }
 0x1cc   :  { %432 = vadd.xlane.f32.xlu1 %v403_v49  ;;  %418 = vadd.xlane.f32.xlu0 %v396_v30  ;;  %v402_v57 = vmul.f32 %v1010_v36, %v1010_v36 }
 0x1cd   :  { %v1001_v54 = vsel %vm373_vm2, %v370_v51, 0.0 }
 0x1ce   :  { %v405_v55 = vmul.f32 %v1001_v54, %v1001_v54 }
 0x1d0   :  { %436 = vadd.xlane.f32.xlu1 %v405_v55  ;;  %426 = vadd.xlane.f32.xlu0 %v400_v56 }
 0x1d4   :  { %430 = vadd.xlane.f32.xlu0 %v402_v57 }
 0x1d8   :  { %434 = vadd.xlane.f32.xlu0 %v404_v59 }
 0x22d   :  { %v407_v61 = vpop.xlane.xlu0 %406 }
 0x22e   :  { %v438_v35 = vmul.f32 0.015625, %v407_v61 }
 0x230   :  { %v454_v62 = vadd.f32 1e-05, %v438_v35 }
 0x231   :  { %v409_v63 = vpop.xlane.xlu1 %408 }
 0x232   :  { %656 = vrsqrt.f32 %v454_v62  ;;  %v439_v1 = vmul.f32 0.015625, %v409_v63 }
 0x234   :  { %v455_v2 = vadd.f32 1e-05, %v439_v1 }
 0x236   :  { %658 = vrsqrt.f32 %v455_v2 }
 0x239   :  { %v413_v5 = vpop.xlane.xlu1 %412 }
 0x23a   :  { %v441_v15 = vmul.f32 0.015625, %v413_v5 }
 0x23f   :  { %v657_v3 = vpop.eup %656 }
 0x240   :  { %v486_v38 = vmul.f32 %v657_v3, %v912_v44  ;;  %v457_v44 = vadd.f32 1e-05, %v441_v15 }
 0x241   :  { %v417_v14 = vpop.xlane.xlu1 %416 }
 0x242   :  { %v507_v7 = vmul.f32 %v1020_v4, %v486_v38  ;;  %660 = vrsqrt.f32 %v457_v44  ;;  %v443_v25 = vmul.f32 0.015625, %v417_v14 }
 0x243   :  { %v659_v8 = vpop.eup %658 }
 0x244   :  { %v528_v9 = vadd.f32 %v1023_v6, %v507_v7  ;;  %v487_v11 = vmul.f32 %v659_v8, %v919_v48  ;;  %v459_v20 = vadd.f32 1e-05, %v443_v25 }
 0x246   :  { %544 = vxpose.xlu0.b32.start [1/16] (narrow) %v528_v9, 64  ;;  %v508_v0 = vmul.f32 %v1020_v4, %v487_v11 }
 0x248   :  { %v529_v16 = vadd.f32 %v1023_v6, %v508_v0 }
 0x249   :  { %v421_v17 = vpop.xlane.xlu1 %420  ;;  %v423_v19 = vpop.xlane.xlu0 %422 }
 0x24a   :  { %545 = vxpose.xlu0.b32.cont [2/16] (narrow) %v529_v16, 64  ;;  %v445_v46 = vmul.f32 0.015625, %v421_v17  ;;  %v446_v59 = vmul.f32 0.015625, %v423_v19 }
 0x24c   :  { %v461_v57 = vadd.f32 1e-05, %v445_v46  ;;  %v462_v2 = vadd.f32 1e-05, %v446_v59 }
 0x24d   :  { %v425_v21 = vpop.xlane.xlu1 %424  ;;  %v411_v23 = vpop.xlane.xlu0 %410 }
 0x24e   :  { %v440_v24 = vmul.f32 0.015625, %v411_v23  ;;  %v447_v3 = vmul.f32 0.015625, %v425_v21 }
 0x24f   :  { %v661_v33 = vpop.eup %660 }
 0x250   :  { %v456_v10 = vadd.f32 1e-05, %v440_v24  ;;  %v489_v1 = vmul.f32 %v661_v33, %v926_v53  ;;  %v463_v16 = vadd.f32 1e-05, %v447_v3 }
 0x251   :  { %v429_v26 = vpop.xlane.xlu1 %428  ;;  %v415_v27 = vpop.xlane.xlu0 %414 }
 0x252   :  { %v449_v48 = vmul.f32 0.015625, %v429_v26  ;;  %v442_v29 = vmul.f32 0.015625, %v415_v27  ;;  %662 = vrsqrt.f32 %v456_v10  ;;  %v510_v0 = vmul.f32 %v1020_v4, %v489_v1 }
 0x254   :  { %v465_v31 = vadd.f32 1e-05, %v449_v48  ;;  %v458_v39 = vadd.f32 1e-05, %v442_v29  ;;  %v531_v24 = vadd.f32 %v1023_v6, %v510_v0 }
 0x255   :  { %v433_v32 = vpop.xlane.xlu1 %432  ;;  %v419_v40 = vpop.xlane.xlu0 %418 }
 0x256   :  { %664 = vrsqrt.f32 %v465_v31  ;;  %v451_v41 = vmul.f32 0.015625, %v433_v32  ;;  %v444_v43 = vmul.f32 0.015625, %v419_v40 }
 0x257   :  { %666 = vrsqrt.f32 %v458_v39 }
 0x258   :  { %v467_v45 = vadd.f32 1e-05, %v451_v41  ;;  %668 = vrsqrt.f32 %v459_v20  ;;  %v460_v49 = vadd.f32 1e-05, %v444_v43 }
 0x259   :  { %v437_v30 = vpop.xlane.xlu1 %436  ;;  %v427_v34 = vpop.xlane.xlu0 %426 }
 0x25a   :  { %670 = vrsqrt.f32 %v467_v45  ;;  %v453_v50 = vmul.f32 0.015625, %v437_v30  ;;  %v448_v51 = vmul.f32 0.015625, %v427_v34 }
 0x25b   :  { %672 = vrsqrt.f32 %v460_v49 }
 0x25c   :  { %v469_v55 = vadd.f32 1e-05, %v453_v50  ;;  %v464_v56 = vadd.f32 1e-05, %v448_v51 }
 0x25d   :  { %v431_v61 = vpop.xlane.xlu0 %430 }
 0x25e   :  { %674 = vrsqrt.f32 %v469_v55  ;;  %v450_v35 = vmul.f32 0.015625, %v431_v61 }
 0x25f   :  { %676 = vrsqrt.f32 %v464_v56  ;;  %v663_v62 = vpop.eup %662 }
 0x260   :  { %v466_v63 = vadd.f32 1e-05, %v450_v35  ;;  %678 = vrsqrt.f32 %v461_v57  ;;  %v488_v5 = vmul.f32 %v663_v62, %v955_v18 }
 0x261   :  { %v435_v38 = vpop.xlane.xlu0 %434 }
 0x262   :  { %680 = vrsqrt.f32 %v466_v63  ;;  %v452_v7 = vmul.f32 0.015625, %v435_v38  ;;  %v509_v9 = vmul.f32 %v1020_v4, %v488_v5 }
 0x263   :  { %v665_v8 = vpop.eup %664  ;;  %682 = vrsqrt.f32 %v462_v2 }
 0x264   :  { %v667_v11 = vpop.eup %666  ;;  %v468_v14 = vadd.f32 1e-05, %v452_v7  ;;  %v497_v15 = vmul.f32 %v665_v8, %v973_v37  ;;  %v530_v53 = vadd.f32 %v1023_v6, %v509_v9 }
 0x265   :  { %v490_v17 = vmul.f32 %v667_v11, %v969_v28  ;;  %v669_v19 = vpop.eup %668 }
 0x266   :  { %684 = vrsqrt.f32 %v468_v14  ;;  %v518_v18 = vmul.f32 %v1020_v4, %v497_v15  ;;  %546 = vxpose.xlu0.b32.cont [3/16] (narrow) %v530_v53, 64  ;;  %v491_v10 = vmul.f32 %v669_v19, %v932_v60 }
 0x267   :  { %v671_v44 = vpop.eup %670  ;;  %686 = vrsqrt.f32 %v463_v16  ;;  %v511_v37 = vmul.f32 %v1020_v4, %v490_v17 }
 0x268   :  { %v539_v21 = vadd.f32 %v1023_v6, %v518_v18  ;;  %v499_v23 = vmul.f32 %v671_v44, %v987_v47  ;;  %v673_v25 = vpop.eup %672  ;;  %v512_v47 = vmul.f32 %v1020_v4, %v491_v10 }
 0x269   :  { %v532_v31 = vadd.f32 %v1023_v6, %v511_v37  ;;  %v492_v39 = vmul.f32 %v673_v25, %v983_v42 }
 0x26a   :  { %v520_v28 = vmul.f32 %v1020_v4, %v499_v23  ;;  %547 = vxpose.xlu0.b32.cont [4/16] (narrow) %v531_v24, 64 }
 0x26b   :  { %v675_v26 = vpop.eup %674  ;;  %v513_v46 = vmul.f32 %v1020_v4, %v492_v39 }
 0x26c   :  { %v677_v27 = vpop.eup %676  ;;  %v541_v48 = vadd.f32 %v1023_v6, %v520_v28  ;;  %v501_v29 = vmul.f32 %v675_v26, %v1001_v54  ;;  %v533_v54 = vadd.f32 %v1023_v6, %v512_v47 }
 0x26d   :  { %v496_v20 = vmul.f32 %v677_v27, %v997_v52  ;;  %v679_v32 = vpop.eup %678 }
 0x26e   :  { %v522_v60 = vmul.f32 %v1020_v4, %v501_v29  ;;  %548 = vxpose.xlu0.b32.cont [5/16] (narrow) %v532_v31, 64  ;;  %v493_v49 = vmul.f32 %v679_v32, %v941_v12 }
 0x26f   :  { %v681_v40 = vpop.eup %680  ;;  %v517_v41 = vmul.f32 %v1020_v4, %v496_v20 }
 0x270   :  { %v498_v43 = vmul.f32 %v681_v40, %v1010_v36  ;;  %v543_v45 = vadd.f32 %v1023_v6, %v522_v60  ;;  %v683_v52 = vpop.eup %682  ;;  %v534_v36 = vadd.f32 %v1023_v6, %v513_v46  ;;  %v514_v55 = vmul.f32 %v1020_v4, %v493_v49 }
 0x271   :  { %v538_v42 = vadd.f32 %v1023_v6, %v517_v41  ;;  %v494_v56 = vmul.f32 %v683_v52, %v945_v13 }
 0x272   :  { %v519_v30 = vmul.f32 %v1020_v4, %v498_v43  ;;  %549 = vxpose.xlu0.b32.cont [6/16] (narrow) %v533_v54, 64  ;;  %v535_v59 = vadd.f32 %v1023_v6, %v514_v55 }
 0x273   :  { %v685_v34 = vpop.eup %684  ;;  %v515_v61 = vmul.f32 %v1020_v4, %v494_v56 }
 0x274   :  { %v540_v50 = vadd.f32 %v1023_v6, %v519_v30  ;;  %v500_v51 = vmul.f32 %v685_v34, %v1016_v58  ;;  %v687_v33 = vpop.eup %686 }
 0x275   :  { %v495_v35 = vmul.f32 %v687_v33, %v959_v22  ;;  %v536_v58 = vadd.f32 %v1023_v6, %v515_v61 }
 0x276   :  { %v521_v12 = vmul.f32 %v1020_v4, %v500_v51  ;;  %550 = vxpose.xlu0.b32.cont [7/16] (narrow) %v534_v36, 64 }
 0x277   :  { %v516_v62 = vmul.f32 %v1020_v4, %v495_v35 }
 0x278   :  { %v542_v57 = vadd.f32 %v1023_v6, %v521_v12 }
 0x279   :  { %v537_v13 = vadd.f32 %v1023_v6, %v516_v62 }
 0x27a   :  { %551 = vxpose.xlu0.b32.cont [8/16] (narrow) %v535_v59, 64 }
 0x27e   :  { %552 = vxpose.xlu0.b32.cont [9/16] (narrow) %v536_v58, 64 }
 0x282   :  { %553 = vxpose.xlu0.b32.cont [10/16] (narrow) %v537_v13, 64 }
 0x286   :  { %554 = vxpose.xlu0.b32.cont [11/16] (narrow) %v538_v42, 64 }
 0x28a   :  { %555 = vxpose.xlu0.b32.cont [12/16] (narrow) %v539_v21, 64 }
 0x28e   :  { %556 = vxpose.xlu0.b32.cont [13/16] (narrow) %v540_v50, 64 }
 0x292   :  { %557 = vxpose.xlu0.b32.cont [14/16] (narrow) %v541_v48, 64 }
 0x296   :  { %558 = vxpose.xlu0.b32.cont [15/16] (narrow) %v542_v57, 64 }
 0x29a   :  { %559 = vxpose.xlu0.b32.end [16/16] (narrow) %v543_v45, 64 }
 0x2da   :  { %v560_v63 = vpop.trf.xlu0 }
 0x2db   :  { %576 = vst [vmem:[%s1099_s3] sm:$0xff] %v560_v63 }
 0x2de   :  { %v561_v22 = vpop.trf.xlu0 }
 0x2df   :  { %577 = vst [vmem:[%s1099_s3 + $0x8] sm:$0xff] %v561_v22 }
 0x2e2   :  { %v562_v4 = vpop.trf.xlu0 }
 0x2e3   :  { %578 = vst [vmem:[%s1099_s3 + $0x10] sm:$0xff] %v562_v4 }
 0x2e6   :  { %v563_v6 = vpop.trf.xlu0 }
 0x2e7   :  { %579 = vst [vmem:[%s1099_s3 + $0x18] sm:$0xff] %v563_v6 }
 0x2ea   :  { %v564_v1 = vpop.trf.xlu0 }
 0x2eb   :  { %580 = vst [vmem:[%s1099_s3 + $0x20] sm:$0xff] %v564_v1 }
 0x2ee   :  { %v565_v2 = vpop.trf.xlu0 }
 0x2ef   :  { %581 = vst [vmem:[%s1099_s3 + $0x28] sm:$0xff] %v565_v2 }
 0x2f2   :  { %v566_v3 = vpop.trf.xlu0 }
 0x2f3   :  { %582 = vst [vmem:[%s1099_s3 + $0x30] sm:$0xff] %v566_v3 }
 0x2f6   :  { %v567_v38 = vpop.trf.xlu0 }
 0x2f7   :  { %583 = vst [vmem:[%s1099_s3 + $0x38] sm:$0xff] %v567_v38 }
 0x2f8   :  { %588 = vsyncpa [#allocation3], 1 }
 0x2f9   :  { %589 = vsyncpa [#allocation5], 1 }

</bundles_post_ra>
